<compile_context>
chip_gen: v7x
topology: tpu7x:2x2x1
jax: 0.10.0
libtpu: 0.0.40
codegen_flags: <defaults>
</compile_context>

<pallas_src>
import jax
import jax.numpy as jnp
from jax.experimental import pallas as pl
from jax.experimental.pallas import tpu as pltpu

# ---- model dims (from Net: 98 -> 49 -> 20 -> 1) -----------------------------
_F_IN, _H1, _H2 = 98, 49, 20
_LANES = 128

# ---- packed-parameter layout -------------------------------------------------
# bf16 matmul-weight slab (rows x 128 lanes):
_W1_ROW = 0        # rows [0, 98):    W1^T (98, 49) in cols 0..48
_W2_ROW = 112      # rows [112, 240): W2^T (49, 20) in cols 0..19 (rows 49.. zero)
_W3_ROW = 240      # row 240:         W3   (20,)    in cols 0..19
_PMM_ROWS = 256
# f32 bias slab:
_B1_ROW, _B2_ROW, _B3_ROW = 0, 8, 16
_PVEC_ROWS = 24


def _round_up(n, m):
    return ((n + m - 1) // m) * m


def _pick_tile_b(B, tile_b):
    tile_b = max(_LANES, _round_up(tile_b, _LANES))
    # Don't allocate a tile (much) larger than the batch.
    tile_b = min(tile_b, max(_LANES, _round_up(B, _LANES)))
    # Keep >=2 grid steps when the batch allows it (v7x megacore sharding).
    if B > _LANES:
        tile_b = min(tile_b, max(_LANES, _round_up(pl.cdiv(B, 2), _LANES)))
    return tile_b


def _sigmoid(z):
    # 1 / (1 + exp(-z)): EUP exp + EUP approx-reciprocal, no VALU selects.
    # Limits are correct: z -> -inf => exp -> inf => recip -> 0.
    return pl.reciprocal(1.0 + jnp.exp(-z), approx=True)


def mlp_kernel(x_ref, pmm_ref, pvec_ref, o_ref):
    # In-kernel bf16 cast of the x tile (free VPU cast; no wrapper HBM pass).
    x = x_ref[...].astype(jnp.bfloat16)                                # (TB, 98)

    # Layer 1: (TB, 98) @ (98, 128) bf16 MXU, f32 accumulation.
    w1 = pmm_ref[_W1_ROW:_W1_ROW + _F_IN, :]                           # (98, 128) bf16
    z1 = jnp.dot(x, w1, preferred_element_type=jnp.float32)            # (TB, 128) f32
    h1 = _sigmoid(z1 + pvec_ref[_B1_ROW:_B1_ROW + 1, :])               # pad lanes -> 0.5

    # Layer 2: (TB, 128) @ (128, 128) bf16 MXU, f32 acc.  Padded rows of W2 are
    # zero, so the 0.5 pad lanes of h1 contribute nothing.
    w2 = pmm_ref[_W2_ROW:_W2_ROW + _LANES, :]                          # (128, 128) bf16
    z2 = jnp.dot(h1.astype(jnp.bfloat16), w2,
                 preferred_element_type=jnp.float32)                   # (TB, 128) f32
    h2 = _sigmoid(z2 + pvec_ref[_B2_ROW:_B2_ROW + 1, :])

    # Layer 3 (out_features == 1): contract lanes of h2 against the w3 row,
    # producing a lane-dense (1, TB) output row directly (no 1-lane stores).
    w3 = pmm_ref[_W3_ROW:_W3_ROW + 1, :]                               # (1, 128) bf16
    z3 = jax.lax.dot_general(
        w3, h2.astype(jnp.bfloat16),
        dimension_numbers=(((1,), (1,)), ((), ())),
        preferred_element_type=jnp.float32)                            # (1, TB) f32
    z3 = z3 + pvec_ref[_B3_ROW:_B3_ROW + 1, 0:1]                       # scalar b3
    o_ref[...] = _sigmoid(z3).reshape(o_ref.shape)                     # (1, 1, TB)


def pack_params(params):
    """Pack PyTorch-layout params into two lane-padded VMEM-resident slabs."""
    w1 = jnp.asarray(params["w1"], jnp.float32)   # (49, 98)  (out, in)
    b1 = jnp.asarray(params["b1"], jnp.float32)   # (49,)
    w2 = jnp.asarray(params["w2"], jnp.float32)   # (20, 49)
    b2 = jnp.asarray(params["b2"], jnp.float32)   # (20,)
    w3 = jnp.asarray(params["w3"], jnp.float32)   # (1, 20)
    b3 = jnp.asarray(params["b3"], jnp.float32)   # (1,)

    pmm = jnp.zeros((_PMM_ROWS, _LANES), jnp.bfloat16)
    pmm = pmm.at[_W1_ROW:_W1_ROW + _F_IN, 0:_H1].set(w1.T.astype(jnp.bfloat16))
    pmm = pmm.at[_W2_ROW:_W2_ROW + _H1, 0:_H2].set(w2.T.astype(jnp.bfloat16))
    pmm = pmm.at[_W3_ROW, 0:_H2].set(w3.reshape(_H2).astype(jnp.bfloat16))

    pvec = jnp.zeros((_PVEC_ROWS, _LANES), jnp.float32)
    pvec = pvec.at[_B1_ROW, 0:_H1].set(b1)
    pvec = pvec.at[_B2_ROW, 0:_H2].set(b2)
    pvec = pvec.at[_B3_ROW, 0].set(b3.reshape(()))
    return pmm, pvec


def net_forward(x, params, *, tile_b=2048):
    """x: (B, 98) float32.  Returns (B, 1) float32 matching Net.forward."""
    B, F = x.shape
    assert F == _F_IN, F

    tile_b = _pick_tile_b(B, tile_b)
    num_blocks = pl.cdiv(B, tile_b)
    pmm, pvec = pack_params(params)

    # Constant index_map -> param slabs stay VMEM-resident across all grid steps.
    resident = lambda arr: pl.BlockSpec(arr.shape, lambda i: (0, 0))

    out = pl.pallas_call(
        mlp_kernel,
        out_shape=jax.ShapeDtypeStruct((num_blocks, 1, tile_b), jnp.float32),
        grid=(num_blocks,),
        in_specs=[
            # x is streamed as full-row (tile_b, 98) blocks; the ragged last
            # block (B % tile_b) is handled by Pallas (those rows are sliced
            # off the output below).
            pl.BlockSpec((tile_b, F), lambda i: (i, 0)),
            resident(pmm),
            resident(pvec),
        ],
        # Lane-dense output block: (1, 1, tile_b).
        out_specs=pl.BlockSpec((1, 1, tile_b), lambda i: (i, 0, 0)),
        compiler_params=pltpu.CompilerParams(
            dimension_semantics=("parallel",),      # megacore sharding on v7x
            vmem_limit_bytes=32 * 1024 * 1024,      # headroom over v5e's 16 MiB default
        ),
    )(x, pmm, pvec)

    # (num_blocks, 1, tile_b) -> (num_blocks*tile_b, 1); drop ragged-tail rows.
    return out.reshape(-1, 1)[:B]


# ----------------------------- references / init ------------------------------

def init_params(key):
    """Deterministic PyTorch-like init: U(-1/sqrt(fan_in), 1/sqrt(fan_in))."""
    ks = jax.random.split(key, 6)

    def uinit(k, shape, fan_in):
        bound = 1.0 / (fan_in ** 0.5)
        return jax.random.uniform(k, shape, jnp.float32, -bound, bound)

    return {
        "w1": uinit(ks[0], (_H1, _F_IN), _F_IN),   # PyTorch (out, in)
        "b1": uinit(ks[1], (_H1,), _F_IN),
        "w2": uinit(ks[2], (_H2, _H1), _H1),
        "b2": uinit(ks[3], (_H2,), _H1),
        "w3": uinit(ks[4], (1, _H2), _H2),
        "b3": uinit(ks[5], (1,), _H2),
    }


def reference_forward(x, params):
    """Exact f32 equivalent of Net.forward."""
    h = jax.nn.sigmoid(x @ params["w1"].T + params["b1"])
    h = jax.nn.sigmoid(h @ params["w2"].T + params["b2"])
    return jax.nn.sigmoid(h @ params["w3"].T + params["b3"])


def reference_forward_quant(x, params):
    """Reference applying the same bf16 quantization of matmul operands."""
    q = lambda a: a.astype(jnp.bfloat16).astype(jnp.float32)
    h = jax.nn.sigmoid(q(x) @ q(params["w1"]).T + params["b1"])
    h = jax.nn.sigmoid(q(h) @ q(params["w2"]).T + params["b2"])
    return jax.nn.sigmoid(q(h) @ q(params["w3"]).T + params["b3"])


if __name__ == "__main__":
    key = jax.random.PRNGKey(0)
    kp, kx = jax.random.split(key)
    params = init_params(kp)

    # Small batch that still exercises a multi-step grid (tile 256 -> 2 steps)
    # with a ragged last block and the lane-dense output path.
    B = 300
    x = jax.random.normal(kx, (B, _F_IN), jnp.float32)

    out = jax.block_until_ready(net_forward(x, params))
    assert out.shape == (B, 1), out.shape
    assert bool(jnp.all(jnp.isfinite(out)))

    ref_exact = reference_forward(x, params)
    ref_quant = reference_forward_quant(x, params)
    err_quant = float(jnp.max(jnp.abs(out - ref_quant)))
    err_exact = float(jnp.max(jnp.abs(out - ref_exact)))
    # bf16 MXU operands + approx-reciprocal sigmoid are deliberate; tolerances
    # reflect that while still catching any structural / weight-mapping bug.
    assert err_quant < 1e-2, (err_quant, err_exact)
    assert err_exact < 3e-2, (err_exact,)

    print("KERNEL_OK")
</pallas_src>

<mosaic_0001>
module attributes {stable_mosaic.version = 11 : i64} {
  func.func @mlp_kernel(%arg0: i32, %arg1: memref<256x98xf32, #tpu.memory_space<vmem>>, %arg2: memref<256x128xbf16, #tpu.memory_space<vmem>>, %arg3: memref<24x128xf32, #tpu.memory_space<vmem>>, %arg4: memref<1x1x256xf32, #tpu.memory_space<vmem>>) attributes {dimension_semantics = [#tpu.dimension_semantics<parallel>], iteration_bounds = array<i64: 2>, scalar_prefetch = 0 : i64, scratch_operands = 0 : i64, tpu.core_type = #tpu.core_type<tc>, window_params = [{transform_indices = @transform_0, window_bounds = array<i64: 256, 98>}, {pipeline_mode = #tpu.pipeline_mode<synchronous>, transform_indices = @transform_1, window_bounds = array<i64: 256, 128>}, {pipeline_mode = #tpu.pipeline_mode<synchronous>, transform_indices = @transform_2, window_bounds = array<i64: 24, 128>}, {transform_indices = @transform_3, window_bounds = array<i64: 1, 1, 256>}]} {
    %c0 = arith.constant 0 : index
    %c0_0 = arith.constant 0 : index
    %0 = vector.load %arg1[%c0, %c0_0] : memref<256x98xf32, #tpu.memory_space<vmem>>, vector<256x98xf32>
    %1 = arith.truncf %0 : vector<256x98xf32> to vector<256x98xbf16>
    %c0_1 = arith.constant 0 : index
    %c0_2 = arith.constant 0 : index
    %2 = vector.load %arg2[%c0_1, %c0_2] : memref<256x128xbf16, #tpu.memory_space<vmem>>, vector<98x128xbf16>
    %cst = arith.constant dense<0.000000e+00> : vector<256x128xf32>
    %3 = tpu.matmul %1, %2, %cst {dimension_numbers = #tpu.dot_dimension_numbers<[1], [0], [0], [1], [0, 0, 1, 1], [], []>} : vector<256x98xbf16>, vector<98x128xbf16>, vector<256x128xf32> -> vector<256x128xf32>
    %c0_3 = arith.constant 0 : index
    %c0_4 = arith.constant 0 : index
    %4 = vector.load %arg3[%c0_3, %c0_4] : memref<24x128xf32, #tpu.memory_space<vmem>>, vector<1x128xf32>
    %5 = vector.broadcast %4 : vector<1x128xf32> to vector<256x128xf32>
    %6 = arith.addf %3, %5 : vector<256x128xf32>
    %cst_5 = arith.constant 0.000000e+00 : f32
    %7 = vector.broadcast %cst_5 : f32 to vector<256x128xf32>
    %8 = arith.subf %7, %6 : vector<256x128xf32>
    %9 = math.exp %8 : vector<256x128xf32>
    %cst_6 = arith.constant 1.000000e+00 : f32
    %10 = vector.broadcast %cst_6 : f32 to vector<256x128xf32>
    %11 = arith.addf %10, %9 : vector<256x128xf32>
    %12 = tpu.reciprocal %11 {approx = true} : vector<256x128xf32> -> vector<256x128xf32>
    %c112 = arith.constant 112 : index
    %c0_7 = arith.constant 0 : index
    %13 = vector.load %arg2[%c112, %c0_7] : memref<256x128xbf16, #tpu.memory_space<vmem>>, vector<128x128xbf16>
    %14 = arith.truncf %12 : vector<256x128xf32> to vector<256x128xbf16>
    %cst_8 = arith.constant dense<0.000000e+00> : vector<256x128xf32>
    %15 = tpu.matmul %14, %13, %cst_8 {dimension_numbers = #tpu.dot_dimension_numbers<[1], [0], [0], [1], [0, 0, 1, 1], [], []>} : vector<256x128xbf16>, vector<128x128xbf16>, vector<256x128xf32> -> vector<256x128xf32>
    %c8 = arith.constant 8 : index
    %c0_9 = arith.constant 0 : index
    %16 = vector.load %arg3[%c8, %c0_9] : memref<24x128xf32, #tpu.memory_space<vmem>>, vector<1x128xf32>
    %17 = vector.broadcast %16 : vector<1x128xf32> to vector<256x128xf32>
    %18 = arith.addf %15, %17 : vector<256x128xf32>
    %cst_10 = arith.constant 0.000000e+00 : f32
    %19 = vector.broadcast %cst_10 : f32 to vector<256x128xf32>
    %20 = arith.subf %19, %18 : vector<256x128xf32>
    %21 = math.exp %20 : vector<256x128xf32>
    %cst_11 = arith.constant 1.000000e+00 : f32
    %22 = vector.broadcast %cst_11 : f32 to vector<256x128xf32>
    %23 = arith.addf %22, %21 : vector<256x128xf32>
    %24 = tpu.reciprocal %23 {approx = true} : vector<256x128xf32> -> vector<256x128xf32>
    %c240 = arith.constant 240 : index
    %c0_12 = arith.constant 0 : index
    %25 = vector.load %arg2[%c240, %c0_12] : memref<256x128xbf16, #tpu.memory_space<vmem>>, vector<1x128xbf16>
    %26 = arith.truncf %24 : vector<256x128xf32> to vector<256x128xbf16>
    %cst_13 = arith.constant dense<0.000000e+00> : vector<1x256xf32>
    %27 = tpu.matmul %25, %26, %cst_13 {dimension_numbers = #tpu.dot_dimension_numbers<[1], [1], [0], [0], [0, 0, 1, 0], [], []>} : vector<1x128xbf16>, vector<256x128xbf16>, vector<1x256xf32> -> vector<1x256xf32>
    %c16 = arith.constant 16 : index
    %c0_14 = arith.constant 0 : index
    %28 = vector.load %arg3[%c16, %c0_14] : memref<24x128xf32, #tpu.memory_space<vmem>>, vector<1x1xf32>
    %29 = vector.broadcast %28 : vector<1x1xf32> to vector<1x256xf32>
    %30 = arith.addf %27, %29 : vector<1x256xf32>
    %cst_15 = arith.constant 0.000000e+00 : f32
    %31 = vector.broadcast %cst_15 : f32 to vector<1x256xf32>
    %32 = arith.subf %31, %30 : vector<1x256xf32>
    %33 = math.exp %32 : vector<1x256xf32>
    %cst_16 = arith.constant 1.000000e+00 : f32
    %34 = vector.broadcast %cst_16 : f32 to vector<1x256xf32>
    %35 = arith.addf %34, %33 : vector<1x256xf32>
    %36 = tpu.reciprocal %35 {approx = true} : vector<1x256xf32> -> vector<1x256xf32>
    %37 = vector.shape_cast %36 : vector<1x256xf32> to vector<1x1x256xf32>
    %c0_17 = arith.constant 0 : index
    %c0_18 = arith.constant 0 : index
    %c0_19 = arith.constant 0 : index
    %38 = vector.load %arg4[%c0_17, %c0_18, %c0_19] : memref<1x1x256xf32, #tpu.memory_space<vmem>>, vector<1x1x256xf32>
    tpu.vector_store %arg4[%c0_17, %c0_18, %c0_19], %37 {strides = array<i32>} : memref<1x1x256xf32, #tpu.memory_space<vmem>>, vector<1x1x256xf32>,
    return
  }
  func.func @transform_0(%arg0: i32) -> (i32, i32) {
    %c0_i32 = arith.constant 0 : i32
    %c0_i32_0 = arith.constant 0 : i32
    return %arg0, %c0_i32 : i32, i32
  }
  func.func @transform_1(%arg0: i32) -> (i32, i32) {
    %c0_i32 = arith.constant 0 : i32
    %c0_i32_0 = arith.constant 0 : i32
    %c0_i32_1 = arith.constant 0 : i32
    return %c0_i32, %c0_i32_0 : i32, i32
  }
  func.func @transform_2(%arg0: i32) -> (i32, i32) {
    %c0_i32 = arith.constant 0 : i32
    %c0_i32_0 = arith.constant 0 : i32
    %c0_i32_1 = arith.constant 0 : i32
    return %c0_i32, %c0_i32_0 : i32, i32
  }
  func.func @transform_3(%arg0: i32) -> (i32, i32, i32) {
    %c0_i32 = arith.constant 0 : i32
    %c0_i32_0 = arith.constant 0 : i32
    %c0_i32_1 = arith.constant 0 : i32
    return %arg0, %c0_i32, %c0_i32_0 : i32, i32, i32
  }
}

</mosaic_0001>

<bundles_post_ra>
// kernel: tpu_custom_call.1
= control target key start
LH: loop header
LB: loop body
LE: loop exit
PB: predicated region body
PF: predicated region fallthrough
CT: control target
= control target key end

     0   :  { %8 = vsyncpa [#allocation3], 0  ;;  %s2496_s0 = inlined_call_operand.hbm [shape: f32[300,98], index: 0, kind: input, shape index: {}]   ;;  %s2497_s1 = inlined_call_operand.hbm [shape: bf16[256,128], index: 1, kind: input, shape index: {}]   ;;  %s2498_s2 = inlined_call_operand.hbm [shape: f32[24,128], index: 2, kind: input, shape index: {}]   ;;  %s2499_s3 = inlined_call_operand.hbm [shape: f32[2,1,256], index: 3, kind: output, shape index: {}]  }
   0x1   :  { %10 = vsyncpa [#allocation3 + $0x1], 0 }
   0x2   :  { %11 = vsyncpa [#allocation6], 0 }
   0x3   :  { %12 = vsyncpa [#allocation4], 0 }
   0x4   :  { %14 = vsyncpa [#allocation4 + $0x1], 0  ;;  %s2070_s12 = smov 0   ;;  %s2072_s13 = smov 0  }
   0x5   :  { %s2074_s14 = smov 0   ;;  %s2076_s15 = smov 0  }
   0x6 LB: > { %s2091_s16 = sadd.s32 4294967295, %s2036_s15   ;;  %s1316_s17 = sadd.s32 4294967294, %s2036_s15   ;;  %s2036_s15 = sphi %s2076_s15, %s2520_s15   ;;  %s2032_s14 = sphi %s2074_s14, %s2519_s14   ;;  %s2028_s13 = sphi %s2072_s13, %s2518_s13   ;;  %s2024_s12 = sphi %s2070_s12, %s2517_s12  }
   0x7   : > { %s2095_s18 = sadd.s32 1, %s2036_s15   ;;  %s27_s19 = sadd.s32 1, %s2032_s14 }
   0x8   : > { %s24_s20 = ssub.s32 %s2036_s15, %s2095_s18  ;;  %p34_p0 = scmp.ne.s32.totalorder %s2032_s14, %s2028_s13 }
   0x9   : > { %p25_p1 = scmp.eq.s32.totalorder %s24_s20, 0  ;;  %p35_p2 = scmp.eq.s32.totalorder %s2036_s15, 0 }
   0xa   : > { %p40_p3 = scmp.ne.s32.totalorder %s2028_s13, %s2024_s12  ;;  %p2500_p4 = scmp.eq.s32.totalorder %s2091_s16, 0 }
   0xb   : > { %s2107_s21 = scalar_select %p25_p1, %s2032_s14, %s27_s19  }
   0xc   : > { %p2109_p5 = por %p35_p2, %p34_p0  ;;  %p2115_p6 = por %p2500_p4, %p40_p3 }
   0xd   : > { %p106_p7 = scmp.eq.s32.totalorder %s2091_s16, 1  ;;  %p112_p8 = scmp.eq.s32.totalorder %s1316_s17, 1 }
   0xe   : > { %s2504_s22 = scalar_select %p2109_p5, 1, 0 }
   0xf   : > { %s2505_s23 = scalar_select %p2115_p6, 1, 0 }
  0x10   : > { %p1317_p9 = scmp.ge.s32.totalorder %s2036_s15, 1  ;;  %p119_p10 = scmp.lt.s32.totalorder %s2036_s15, 3 }
  0x11   : > { %p2122_p11 = por %p106_p7, %p34_p0  ;;  %p2126_p12 = por %p112_p8, %p40_p3 }
  0x12   : > { %p2130_p13 = pnand %p1317_p9, %p119_p10  ;;  %s2038_s27 = smov [#allocation5]  }
  0x13   : > { %s2506_s24 = scalar_select %p2122_p11, 1, 0 }
  0x14   : > { %s2507_s25 = scalar_select %p2126_p12, 1, 0 }
  0x15   : > { %s2508_s26 = scalar_select %p2130_p13, 1, 0 }
  0x16   : > { %p1544_p1 = pneg %p2130_p13  ;;  %s131_s28 = sshll.u32 %s2038_s27, 4  ;;  %s132_s28 = int_to_ptr.vmem [resolvable:$true] %s131_s28 }
  0x17   : > { %s2039_s30 = smov [#allocation7]   ;;  %s1882_s7 = scalar_lea.hbm %s2497_s1, 2048 }
  0x18   : > { %p2138_p2 = pnand %p1544_p1, %p2500_p4  ;;  %s144_s4 = sshll.u32 %s2039_s30, 4  ;;  %s2142_s4 = int_to_ptr.vmem [resolvable:$true] %s144_s4 }
  0x19   : > { %p1883_p0 = scmp.ne.s32.totalorder %s2497_s1, %s1882_s7  ;;  %p1889_p9 = scmp.lt.u32.totalorder %s1882_s7, %s2497_s1 }
  0x1a   : > { %p1884_p3 = pneg %p2138_p2 }
  0x1c   : > { %p1885_p7 = pnand %p1884_p3, %p1883_p0 }
  0x1e   : > { %p1886_p8 = pneg %p1885_p7 }
  0x20   : > { %p1891_p10 = pnand %p1889_p9, %p1886_p8 }
  0x22   : > { %1894 = shalt.err (!%p1891_p10)
}
  0x23   : > { %s1895_s17 = scalar_lea.vmem %s132_s28, 2048  ;;  %p1903_p11 = scmp.lt.s32.totalorder %s132_s28, %s132_s28 }
  0x24   : > { %p1896_p1 = scmp.ne.s32.totalorder %s132_s28, %s1895_s17  ;;  %p1904_p6 = scmp.lt.s32.totalorder %s1895_s17, %s1895_s17 }
  0x26   : > { %p1898_p4 = pnand %p1896_p1, %p1884_p3  ;;  %p1905_p13 = por %p1904_p6, %p1903_p11 }
  0x28   : > { %p1899_p12 = pneg %p1898_p4 }
  0x2a   : > { %p1906_p5 = pnand %p1905_p13, %p1899_p12 }
  0x2c   : > { %1909 = shalt.err (!%p1906_p5)
}
  0x2d   : > { %s2040_s19 = smov 64   ;;  %s2041_s20 = smov 4  }
  0x2e   : > { %1547 = dma.hbm_to_vmem [thread:$0]  (!%p2138_p2), %s2497_s1, 2048, %s132_s28, [#allocation6], %s2040_s19, %s2040_s19, %s2041_s20  }
  0x2f   : > { %s1910_s7 = scalar_lea.hbm %s2498_s2, 384 }
  0x30   : > { %p1911_p4 = scmp.ne.s32.totalorder %s2498_s2, %s1910_s7  ;;  %p1917_p11 = scmp.lt.u32.totalorder %s1910_s7, %s2498_s2 }
  0x32   : > { %p1913_p5 = pnand %p1911_p4, %p1884_p3 }
  0x34   : > { %p1914_p6 = pneg %p1913_p5 }
  0x36   : > { %p1919_p12 = pnand %p1917_p11, %p1914_p6 }
  0x38   : > { %1922 = shalt.err (!%p1919_p12)
}
  0x39   : > { %s1923_s28 = scalar_lea.vmem %s2142_s4, 384  ;;  %p1931_p8 = scmp.lt.s32.totalorder %s2142_s4, %s2142_s4 }
  0x3a   : > { %p1924_p13 = scmp.ne.s32.totalorder %s2142_s4, %s1923_s28  ;;  %p1932_p9 = scmp.lt.s32.totalorder %s1923_s28, %s1923_s28 }
  0x3c   : > { %p1926_p0 = pnand %p1924_p13, %p1884_p3  ;;  %p1933_p10 = por %p1932_p9, %p1931_p8 }
  0x3e   : > { %p1927_p7 = pneg %p1926_p0 }
  0x40   : > { %p1934_p1 = pnand %p1933_p10, %p1927_p7 }
  0x42   : > { %1937 = shalt.err (!%p1934_p1)
}
  0x43   : > { %s2042_s17 = smov 128   ;;  %s2043_s19 = smov 8  }
  0x44   : > { %1550 = dma.hbm_to_vmem [thread:$0]  (!%p2138_p2), %s2498_s2, 384, %s2142_s4, [#allocation6], %s2042_s17, %s2042_s17, %s2043_s19  }
  0x45   : > { %p1320_p4 = scmp.ge.s32.totalorder %s2036_s15, 2 }
  0x46   : > { %p2510_p3 = scmp.ne.s32.totalorder (!%p1320_p4), %s2504_s22, 0 }
  0x47   : > { %154 = sbr.rel (%p1320_p4) target bundleno = 113 (0x71), region = 24 }
  0x4e   : > { %157 = sbr.rel (!%p2510_p3) target bundleno = 113 (0x71), region = 28  ;;  %s158_s30 = sand.u32 (%p2510_p3), 1, %s2032_s14  }
  0x4f   : > { %s1322_s5 = sshll.u32 (%p2510_p3), %s2036_s15, 5  ;;  %s1321_s6 = sshll.u32 (%p2510_p3), %s158_s30, 8 }
  0x50   : > { %s164_s7 = ssub.s32 (%p2510_p3), 38, %s1322_s5  ;;  %s2201_s8 = scalar_lea.sflag (%p2510_p3), [#allocation3], %s158_s30 }
  0x51   : > { %p165_p5 = scmp.lt.s32.totalorder (%p2510_p3), %s164_s7, 32  ;;  %s162_s9 = scalar_lea.vmem (%p2510_p3), [#allocation2], %s1321_s6 }
  0x55   : > { %s2522_s7 = smov (!%p165_p5, %s164_s7), 32 }
  0x56   : > { %s2198_s29 = sshll.u32 %s2522_s7, 7 }
  0x57   : > { %s169_s4 = ssub.s32 4096, %s2198_s29 }
  0x58   : > { %170 = vsyncadd %s2201_s8, %s169_s4  ;;  %p1324_p2 = scmp.ne.s32.totalorder %s2198_s29, 0  ;;  %s1371_s22 = sshll.u32 %s2036_s15, 12 }
  0x59   : > { %s2209_s28 = scalar_lea.hbm %s2496_s0, %s1371_s22  ;;  %s175_s17 = sshll.u32 %s162_s9, 4  ;;  %s2211_s17 = int_to_ptr.vmem [resolvable:$true] %s175_s17 }
  0x5a   : > { %s1938_s19 = scalar_lea.hbm %s2209_s28, %s2198_s29  ;;  %s1942_s30 = scalar_lea.hbm %s2496_s0, 4864 }
  0x5b   : > { %p1939_p6 = scmp.ne.s32.totalorder %s2209_s28, %s1938_s19  ;;  %p1943_p13 = scmp.lt.u32.totalorder %s2209_s28, %s2496_s0 }
  0x5c   : > { %p1944_p0 = scmp.lt.u32.totalorder %s1942_s30, %s1938_s19  ;;  %p1946_p8 = scmp.lt.u32.totalorder %s1938_s19, %s2209_s28 }
  0x5d   : > { %p1940_p11 = pnand %p1939_p6, %p1324_p2 }
  0x5e   : > { %p1945_p7 = por %p1944_p0, %p1943_p13 }
  0x5f   : > { %p1941_p12 = pneg %p1940_p11 }
  0x60   : > { %p1947_p9 = por %p1946_p8, %p1945_p7 }
  0x62   : > { %p1948_p10 = pnand %p1947_p9, %p1941_p12 }
  0x64   : > { %1951 = shalt.err (!%p1948_p10)
}
  0x65   : > { %s1952_s7 = scalar_lea.vmem %s2211_s17, %s2198_s29  ;;  %s2044_s4 = smov [#allocation2]  }
  0x66   : > { %p1953_p1 = scmp.ne.s32.totalorder %s2211_s17, %s1952_s7  ;;  %s1956_s9 = sshll.u32 %s2044_s4, 4  ;;  %s1957_s9 = int_to_ptr.vmem [resolvable:$false] %s1956_s9 }
  0x67   : > { %s1958_s22 = scalar_lea.vmem %s1957_s9, 8192  ;;  %p1959_p6 = scmp.lt.s32.totalorder %s2211_s17, %s1957_s9 }
  0x68   : > { %p1954_p3 = pnand %p1953_p1, %p1324_p2  ;;  %p1960_p11 = scmp.lt.s32.totalorder %s1958_s22, %s1952_s7 }
  0x6a   : > { %p1955_p5 = pneg %p1954_p3  ;;  %p1961_p13 = por %p1960_p11, %p1959_p6 }
  0x6c   : > { %p1962_p0 = pnand %p1961_p13, %p1955_p5 }
  0x6e   : > { %1965 = shalt.err (!%p1962_p0)
}
  0x6f   : > { %s2045_s10 = smov 128   ;;  %s2046_s11 = smov 8  }
  0x70   : > { %181 = dma.hbm_to_vmem [thread:$0]  (%p1324_p2), %s2209_s28, %s2198_s29, %s2211_s17, %s2201_s8, %s2045_s10, %s2045_s10, %s2046_s11  }
  0x71 PF: > { %p2511_p12 = scmp.ne.s32.totalorder %s2508_s26, 0 }
  0x72   : > { %s2241_s19 = sand.u32 (!%p2511_p12), 1, %s2028_s13   ;;  %p2512_p7 = scmp.ne.s32.totalorder (!%p2511_p12), %s2505_s23, 0 }
  0x73   : > { %187 = sbr.rel (%p2511_p12) target bundleno = 1011 (0x3f3), region = 32  ;;  %s1329_s20 = sshll.u32 (!%p2511_p12), %s2241_s19, 8 }
  0x74   : > { %s190_s27 = scalar_lea.sflag (!%p2511_p12), [#allocation3], %s2241_s19  ;;  %s2245_s30 = scalar_lea.vmem (!%p2511_p12), [#allocation2], %s1329_s20 }
  0x7a   : > { %2011 = dma.done.wait (%p2512_p7), %s190_s27, 4096  }
  0x7b   : > { %2013 = vsyncadd (%p2512_p7), %s190_s27, 4294963200  ;;  %p2513_p2 = scmp.eq.s32.totalorder %s2091_s16, 0 }
  0x7d   : > { %2015 = dma.done.wait (%p2513_p2), [#allocation6], 2432   ;;  %p2514_p8 = pmov %p2513_p2 }
  0x7e   : > { %v1603_v0 = vld [vmem:[#allocation5] sm:$0xff]   ;;  %v1604_v1 = vld [vmem:[#allocation5 + $0x8] sm:$0xff]   ;;  %v1605_v2 = vld [vmem:[#allocation5 + $0x10] sm:$0xff]   ;;  %vm335_vm0 = vcmask 801792   ;;  %vm384_vm1 = vcmask 1040384   ;;  %s1332_s23 = sshll.u32 %s2241_s19, 1 }
  0x7f   : > { %2017 = vsyncadd (%p2514_p8), [#allocation6], 4294964864  ;;  %1438 = vmatprep.subr.bf16.mxu0 %v1603_v0  ;;  %v230_v3 = vld [vmem:[%s2245_s30] sm:$0xff]  ;;  %v231_v4 = vld [vmem:[%s2245_s30 + $0x8] sm:$0xff]  ;;  %s1372_s26 = sshll.u32 %s2091_s16, 5  ;;  %s223_s29 = scalar_lea.vmem [#allocation8], %s1332_s23 }
  0x80   : > { %1439 = vmatpush3.bf16.msra.mxu0 %v1603_v0  ;;  %v1606_v5 = vld [vmem:[#allocation5 + $0x18] sm:$0xff]   ;;  %v262_v6 = vpack.c.bf16 %v231_v4, %v230_v3  ;;  %v1607_v7 = vld [vmem:[#allocation5 + $0x20] sm:$0xff]   ;;  %v1608_v8 = vld [vmem:[#allocation5 + $0x28] sm:$0xff]   ;;  %s1227_s8 = sshll.u32 %s223_s29, 4  ;;  %s2452_s5 = scalar_lea.hbm %s2499_s3, %s1372_s26  ;;  %s2454_s8 = int_to_ptr.vmem [resolvable:$true] %s1227_s8 }
  0x81   : > { %1440 = vmatprep.subr.bf16.mxu0 %v1604_v1  ;;  %v1609_v9 = vld [vmem:[#allocation5 + $0x30] ss:$0 sps:$4 sm:$0x11]   ;;  %v233_v11 = vld [vmem:[%s2245_s30 + $0x18] sm:$0xff]  ;;  %v234_v13 = vld [vmem:[%s2245_s30 + $0x20] sm:$0xff]  ;;  %s1213_s6 = scalar_lea.sflag [#allocation4], %s2241_s19 }
  0x82   : > { %1452 = vmatprep.mubr.msk.bf16.mxu0 %vm335_vm0, %v262_v6  ;;  %v232_v10 = vld [vmem:[%s2245_s30 + $0x10] sm:$0xff]  ;;  %v386_v12 = vsel %vm384_vm1, %v1609_v9, 0  ;;  %v235_v14 = vld [vmem:[%s2245_s30 + $0x28] sm:$0xff]  ;;  %v237_v18 = vld [vmem:[%s2245_s30 + $0x38] sm:$0xff]  ;;  %s1966_s7 = scalar_lea.vmem %s2454_s8, 32  ;;  %p2515_p10 = scmp.ne.s32.totalorder %s2506_s24, 0 }
  0x83   : > { %v263_v15 = vpack.c.bf16 %v233_v11, %v232_v10  ;;  %v264_v16 = vpack.c.bf16 %v235_v14, %v234_v13  ;;  %v236_v17 = vld [vmem:[%s2245_s30 + $0x30] sm:$0xff]  ;;  %v238_v19 = vld [vmem:[%s2245_s30 + $0x40] sm:$0xff]  ;;  %v239_v20 = vld [vmem:[%s2245_s30 + $0x48] sm:$0xff]  ;;  %p1967_p9 = scmp.ne.s32.totalorder %s2454_s8, %s1966_s7  ;;  %s2049_s16 = smov [#allocation8]  }
  0x84   : > { %1441 = vmatpush3.bf16.msra.mxu0 %v1604_v1  ;;  %v265_v21 = vpack.c.bf16 %v237_v18, %v236_v17  ;;  %v266_v22 = vpack.c.bf16 %v239_v20, %v238_v19  ;;  %v240_v23 = vld [vmem:[%s2245_s30 + $0x50] sm:$0xff]  ;;  %v241_v24 = vld [vmem:[%s2245_s30 + $0x58] sm:$0xff]  ;;  %v242_v25 = vld [vmem:[%s2245_s30 + $0x60] sm:$0xff]  ;;  %s1970_s4 = sshll.u32 %s2049_s16, 4  ;;  %s1971_s4 = int_to_ptr.vmem [resolvable:$false] %s1970_s4 }
  0x85   : > { %1442 = vmatprep.subr.bf16.mxu0 %v1605_v2  ;;  %v243_v26 = vld [vmem:[%s2245_s30 + $0x68] sm:$0xff]  ;;  %v267_v27 = vpack.c.bf16 %v241_v24, %v240_v23  ;;  %v244_v29 = vld [vmem:[%s2245_s30 + $0x70] sm:$0xff]  ;;  %v245_v30 = vld [vmem:[%s2245_s30 + $0x78] sm:$0xff]  ;;  %p1968_p1 = pnand %p1967_p9, %p2515_p10  ;;  %s1972_s9 = scalar_lea.vmem %s1971_s4, 64 }
  0x86   : > { %v268_v28 = vpack.c.bf16 %v243_v26, %v242_v25  ;;  %v246_v31 = vld [vmem:[%s2245_s30 + $0x80] sm:$0xff]  ;;  %v247_v32 = vld [vmem:[%s2245_s30 + $0x88] sm:$0xff]  ;;  %v269_v33 = vpack.c.bf16 %v245_v30, %v244_v29  ;;  %v248_v35 = vld [vmem:[%s2245_s30 + $0x90] sm:$0xff]  ;;  %p1973_p5 = scmp.lt.s32.totalorder %s2454_s8, %s1971_s4  ;;  %p1974_p6 = scmp.lt.s32.totalorder %s1972_s9, %s1966_s7 }
  0x87   : > { %v270_v34 = vpack.c.bf16 %v247_v32, %v246_v31  ;;  %v249_v36 = vld [vmem:[%s2245_s30 + $0x98] sm:$0xff]  ;;  %v250_v37 = vld [vmem:[%s2245_s30 + $0xa0] sm:$0xff]  ;;  %v251_v38 = vld [vmem:[%s2245_s30 + $0xa8] sm:$0xff]  ;;  %p1969_p3 = pneg %p1968_p1 }
  0x88   : > { %1443 = vmatpush3.bf16.msra.mxu0 %v1605_v2  ;;  %v271_v39 = vpack.c.bf16 %v249_v36, %v248_v35  ;;  %v272_v40 = vpack.c.bf16 %v251_v38, %v250_v37  ;;  %v252_v41 = vld [vmem:[%s2245_s30 + $0xb0] sm:$0xff]  ;;  %v253_v42 = vld [vmem:[%s2245_s30 + $0xb8] sm:$0xff]  ;;  %v254_v43 = vld [vmem:[%s2245_s30 + $0xc0] sm:$0xff]  ;;  %p1975_p11 = por %p1974_p6, %p1973_p5 }
  0x89   : > { %1444 = vmatprep.subr.bf16.mxu0 %v1606_v5  ;;  %v255_v44 = vld [vmem:[%s2245_s30 + $0xc8] sm:$0xff]  ;;  %v273_v45 = vpack.c.bf16 %v253_v42, %v252_v41  ;;  %v256_v47 = vld [vmem:[%s2245_s30 + $0xd0] sm:$0xff]  ;;  %v257_v48 = vld [vmem:[%s2245_s30 + $0xd8] sm:$0xff] }
  0x8a   : > { %v274_v46 = vpack.c.bf16 %v255_v44, %v254_v43  ;;  %v258_v49 = vld [vmem:[%s2245_s30 + $0xe0] sm:$0xff]  ;;  %v259_v50 = vld [vmem:[%s2245_s30 + $0xe8] sm:$0xff]  ;;  %v275_v51 = vpack.c.bf16 %v257_v48, %v256_v47  ;;  %v260_v53 = vld [vmem:[%s2245_s30 + $0xf0] sm:$0xff]  ;;  %p1976_p13 = pnand %p1975_p11, %p1969_p3 }
  0x8b   : > { %v276_v52 = vpack.c.bf16 %v259_v50, %v258_v49  ;;  %v261_v54 = vld [vmem:[%s2245_s30 + $0xf8] sm:$0xff]  ;;  %v1611_v57 = vld [vmem:[#allocation5 + $0x40] sm:$0xff]   ;;  %v1612_v58 = vld [vmem:[#allocation5 + $0x48] sm:$0xff]  }
  0x8c   : > { %1445 = vmatpush3.bf16.msra.mxu0 %v1606_v5  ;;  %v277_v55 = vpack.c.bf16 %v261_v54, %v260_v53  ;;  %v1610_v56 = vld [vmem:[#allocation5 + $0x38] sm:$0xff]   ;;  %v1613_v59 = vld [vmem:[#allocation5 + $0x50] sm:$0xff]   ;;  %v1615_v61 = vld [vmem:[#allocation5 + $0x60] sm:$0xff]  }
  0x8d   : > { %1446 = vmatprep.subr.bf16.mxu0 %v1607_v7  ;;  %1484 = vmatprep.subr.bf16.mxu1 %v1610_v56  ;;  %v1614_v60 = vld [vmem:[#allocation5 + $0x58] sm:$0xff]   ;;  %v1616_v62 = vld [vmem:[#allocation5 + $0x68] sm:$0xff]   ;;  %v1617_v63 = vld [vmem:[#allocation5 + $0x70] sm:$0xff]  }
  0x8e   : > { %1485 = vmatpush3.bf16.msra.mxu1 %v1610_v56  ;;  %v2303_v0 = vld [vmem:[#allocation7] ss:$0 sm:$0xff] }
  0x8f   : > { %1486 = vmatprep.subr.bf16.mxu1 %v1611_v57 }
  0x90   : > { %1447 = vmatpush3.bf16.msra.mxu0 %v1607_v7 }
  0x91   : > { %1448 = vmatprep.subr.bf16.mxu0 %v1608_v8 }
  0x92   : > { %1487 = vmatpush3.bf16.msra.mxu1 %v1611_v57 }
  0x93   : > { %1488 = vmatprep.subr.bf16.mxu1 %v1612_v58 }
  0x94   : > { %1449 = vmatpush3.bf16.msra.mxu0 %v1608_v8 }
  0x95   : > { %1532 = vmatprep.subr.msk.bf16.mxu0 %vm384_vm1, %v1609_v9 }
  0x96   : > { %1489 = vmatpush3.bf16.msra.mxu1 %v1612_v58 }
  0x97   : > { %1490 = vmatprep.subr.bf16.mxu1 %v1613_v59 }
  0x98   : > { %1451 = vmatpush3.bf16.msra.mxu0 %v386_v12 }
  0x9a   : > { %1491 = vmatpush3.bf16.msra.mxu1 %v1613_v59 }
  0x9b   : > { %1453 = vmatmul.mubr.msk.bf16.vlgmr.msra.gmra.mrb[0].mxu0 %vm335_vm0, %v263_v15  ;;  %1492 = vmatprep.subr.bf16.mxu1 %v1614_v60 }
  0x9c   : > { %1456 = vmatprep.mubr.msk.bf16.mxu0 %vm335_vm0, %v264_v16 }
  0x9e   : > { %1493 = vmatpush3.bf16.msra.mxu1 %v1614_v60 }
  0x9f   : > { %1494 = vmatprep.subr.bf16.mxu1 %v1615_v61 }
  0xa2   : > { %1495 = vmatpush3.bf16.msra.mxu1 %v1615_v61 }
  0xa3   : > { %1457 = vmatmul.mubr.msk.bf16.gmra.mrb[4].mxu0 %vm335_vm0, %v265_v21  ;;  %1496 = vmatprep.subr.bf16.mxu1 %v1616_v62 }
  0xa4   : > { %1460 = vmatprep.mubr.msk.bf16.mxu0 %vm335_vm0, %v266_v22 }
  0xa6   : > { %1497 = vmatpush3.bf16.msra.mxu1 %v1616_v62 }
  0xa7   : > { %1498 = vmatprep.subr.bf16.mxu1 %v1617_v63 }
  0xaa   : > { %1499 = vmatpush3.bf16.msra.mxu1 %v1617_v63 }
  0xab   : > { %1461 = vmatmul.mubr.msk.bf16.gmra.mrb[8].mxu0 %vm335_vm0, %v267_v27 }
  0xac   : > { %1464 = vmatprep.mubr.msk.bf16.mxu0 %vm335_vm0, %v268_v28 }
  0xb3   : > { %1465 = vmatmul.mubr.msk.bf16.gmra.mrb[12].mxu0 %vm335_vm0, %v269_v33 }
  0xb4   : > { %1468 = vmatprep.mubr.msk.bf16.mxu0 %vm335_vm0, %v270_v34 }
  0xbb   : > { %1469 = vmatmul.mubr.msk.bf16.gmra.mrb[16].mxu0 %vm335_vm0, %v271_v39 }
  0xbc   : > { %1472 = vmatprep.mubr.msk.bf16.mxu0 %vm335_vm0, %v272_v40 }
  0xc3   : > { %1473 = vmatmul.mubr.msk.bf16.gmra.mrb[20].mxu0 %vm335_vm0, %v273_v45 }
  0xc4   : > { %1476 = vmatprep.mubr.msk.bf16.mxu0 %vm335_vm0, %v274_v46 }
  0xcb   : > { %1477 = vmatmul.mubr.msk.bf16.gmra.mrb[24].mxu0 %vm335_vm0, %v275_v51 }
  0xcc   : > { %1480 = vmatprep.mubr.msk.bf16.mxu0 %vm335_vm0, %v276_v52 }
  0xd3   : > { %1481 = vmatmul.mubr.msk.bf16.gmra.mrb[28].mxu0 %vm335_vm0, %v277_v55 }
 0x16e   : > { %v1454_v1 = vpop.f32.mrb[0].mxu0 }
 0x16f   : > { %v431_v2 = vadd.f32 %v1454_v1, %v2303_v0  ;;  %v422_v3 = vpop.f32.mrb[1].mxu0 }
 0x170   : > { %v423_v4 = vadd.f32 %v2303_v0, %v422_v3  ;;  %v1455_v5 = vpop.f32.mrb[2].mxu0 }
 0x171   : > { %v551_v6 = vsub.f32 0.0, %v431_v2  ;;  %v434_v7 = vadd.f32 %v1455_v5, %v2303_v0  ;;  %v425_v8 = vpop.f32.mrb[3].mxu0 }
 0x172   : > { %v549_v9 = vsub.f32 0.0, %v423_v4  ;;  %v426_v10 = vadd.f32 %v2303_v0, %v425_v8 }
 0x173   : > { %v585_v11 = vmul.f32 1.442695, %v551_v6  ;;  %v552_v12 = vsub.f32 0.0, %v434_v7 }
 0x174   : > { %v581_v13 = vmul.f32 1.442695, %v549_v9  ;;  %v550_v14 = vsub.f32 0.0, %v426_v10 }
 0x175   : > { %1618 = vpow2.f32 %v585_v11  ;;  %v587_v15 = vmul.f32 1.442695, %v552_v12 }
 0x176   : > { %1620 = vpow2.f32 %v581_v13  ;;  %v583_v16 = vmul.f32 1.442695, %v550_v14  ;;  %v1458_v17 = vpop.f32.mrb[4].mxu0 }
 0x177   : > { %1622 = vpow2.f32 %v587_v15  ;;  %v447_v18 = vadd.f32 %v1458_v17, %v2303_v0  ;;  %v438_v19 = vpop.f32.mrb[5].mxu0 }
 0x178   : > { %1624 = vpow2.f32 %v583_v16  ;;  %v439_v20 = vadd.f32 %v2303_v0, %v438_v19  ;;  %v1459_v21 = vpop.f32.mrb[6].mxu0 }
 0x179   : > { %v555_v22 = vsub.f32 0.0, %v447_v18  ;;  %v450_v23 = vadd.f32 %v1459_v21, %v2303_v0  ;;  %v441_v24 = vpop.f32.mrb[7].mxu0 }
 0x17a   : > { %v553_v25 = vsub.f32 0.0, %v439_v20  ;;  %v442_v26 = vadd.f32 %v2303_v0, %v441_v24 }
 0x17b   : > { %v593_v27 = vmul.f32 1.442695, %v555_v22  ;;  %v556_v28 = vsub.f32 0.0, %v450_v23 }
 0x17c   : > { %v589_v29 = vmul.f32 1.442695, %v553_v25  ;;  %v554_v30 = vsub.f32 0.0, %v442_v26 }
 0x17d   : > { %1626 = vpow2.f32 %v593_v27  ;;  %v595_v31 = vmul.f32 1.442695, %v556_v28 }
 0x17e   : > { %1628 = vpow2.f32 %v589_v29  ;;  %v591_v32 = vmul.f32 1.442695, %v554_v30  ;;  %v1462_v33 = vpop.f32.mrb[8].mxu0 }
 0x17f   : > { %v1619_v34 = vpop.eup %1618  ;;  %1630 = vpow2.f32 %v595_v31  ;;  %v463_v35 = vadd.f32 %v1462_v33, %v2303_v0  ;;  %v454_v36 = vpop.f32.mrb[9].mxu0 }
 0x180   : > { %v1621_v37 = vpop.eup %1620  ;;  %v647_v38 = vadd.f32 1.0, %v1619_v34  ;;  %1632 = vpow2.f32 %v591_v32  ;;  %v455_v39 = vadd.f32 %v2303_v0, %v454_v36  ;;  %v1463_v40 = vpop.f32.mrb[10].mxu0 }
 0x181   : > { %v1623_v41 = vpop.eup %1622  ;;  %v645_v42 = vadd.f32 1.0, %v1621_v37  ;;  %v559_v43 = vsub.f32 0.0, %v463_v35  ;;  %v466_v44 = vadd.f32 %v1463_v40, %v2303_v0  ;;  %v457_v45 = vpop.f32.mrb[11].mxu0 }
 0x182   : > { %v1625_v46 = vpop.eup %1624  ;;  %1634 = vrcp.f32 %v647_v38  ;;  %v648_v47 = vadd.f32 1.0, %v1623_v41  ;;  %v557_v48 = vsub.f32 0.0, %v455_v39  ;;  %v458_v49 = vadd.f32 %v2303_v0, %v457_v45 }
 0x183   : > { %1636 = vrcp.f32 %v645_v42  ;;  %v646_v50 = vadd.f32 1.0, %v1625_v46  ;;  %v601_v51 = vmul.f32 1.442695, %v559_v43  ;;  %v560_v52 = vsub.f32 0.0, %v466_v44 }
 0x184   : > { %1638 = vrcp.f32 %v648_v47  ;;  %v597_v53 = vmul.f32 1.442695, %v557_v48  ;;  %v558_v54 = vsub.f32 0.0, %v458_v49 }
 0x185   : > { %1640 = vrcp.f32 %v646_v50  ;;  %v603_v55 = vmul.f32 1.442695, %v560_v52 }
 0x186   : > { %1642 = vpow2.f32 %v601_v51  ;;  %v599_v56 = vmul.f32 1.442695, %v558_v54  ;;  %v1466_v57 = vpop.f32.mrb[12].mxu0 }
 0x187   : > { %v1627_v58 = vpop.eup %1626  ;;  %1644 = vpow2.f32 %v597_v53  ;;  %v479_v59 = vadd.f32 %v1466_v57, %v2303_v0  ;;  %v470_v60 = vpop.f32.mrb[13].mxu0 }
 0x188   : > { %v1629_v61 = vpop.eup %1628  ;;  %v651_v62 = vadd.f32 1.0, %v1627_v58  ;;  %1646 = vpow2.f32 %v603_v55  ;;  %v471_v63 = vadd.f32 %v2303_v0, %v470_v60  ;;  %v1467_v1 = vpop.f32.mrb[14].mxu0 }
 0x189   : > { %v1631_v2 = vpop.eup %1630  ;;  %v649_v3 = vadd.f32 1.0, %v1629_v61  ;;  %1648 = vpow2.f32 %v599_v56  ;;  %v563_v4 = vsub.f32 0.0, %v479_v59  ;;  %v482_v5 = vadd.f32 %v1467_v1, %v2303_v0  ;;  %v473_v6 = vpop.f32.mrb[15].mxu0 }
 0x18a   : > { %v1633_v7 = vpop.eup %1632  ;;  %1650 = vrcp.f32 %v651_v62  ;;  %v652_v8 = vadd.f32 1.0, %v1631_v2  ;;  %v561_v9 = vsub.f32 0.0, %v471_v63  ;;  %v474_v10 = vadd.f32 %v2303_v0, %v473_v6 }
 0x18b   : > { %1652 = vrcp.f32 %v649_v3  ;;  %v650_v11 = vadd.f32 1.0, %v1633_v7  ;;  %v609_v12 = vmul.f32 1.442695, %v563_v4  ;;  %v564_v13 = vsub.f32 0.0, %v482_v5 }
 0x18c   : > { %v1635_v14 = vpop.eup %1634  ;;  %1654 = vrcp.f32 %v652_v8  ;;  %v605_v15 = vmul.f32 1.442695, %v561_v9  ;;  %v562_v16 = vsub.f32 0.0, %v474_v10 }
 0x18d   : > { %v1637_v17 = vpop.eup %1636  ;;  %1656 = vrcp.f32 %v650_v11  ;;  %v611_v18 = vmul.f32 1.442695, %v564_v13 }
 0x18e   : > { %v1639_v19 = vpop.eup %1638  ;;  %1658 = vpow2.f32 %v609_v12  ;;  %v607_v20 = vmul.f32 1.442695, %v562_v16  ;;  %v1470_v21 = vpop.f32.mrb[16].mxu0 }
 0x18f   : > { %v1641_v22 = vpop.eup %1640  ;;  %1660 = vpow2.f32 %v605_v15  ;;  %v495_v23 = vadd.f32 %v1470_v21, %v2303_v0  ;;  %v486_v24 = vpop.f32.mrb[17].mxu0  ;;  %v726_v25 = vpack.c.bf16 %v1639_v19, %v1635_v14 }
 0x190   : > { %v1643_v26 = vpop.eup %1642  ;;  %1662 = vpow2.f32 %v611_v18  ;;  %v487_v27 = vadd.f32 %v2303_v0, %v486_v24  ;;  %v1471_v28 = vpop.f32.mrb[18].mxu0  ;;  %v725_v29 = vpack.c.bf16 %v1641_v22, %v1637_v17 }
 0x191   : > { %v1645_v30 = vpop.eup %1644  ;;  %v655_v31 = vadd.f32 1.0, %v1643_v26  ;;  %1664 = vpow2.f32 %v607_v20  ;;  %v567_v32 = vsub.f32 0.0, %v495_v23  ;;  %v498_v33 = vadd.f32 %v1471_v28, %v2303_v0  ;;  %v489_v34 = vpop.f32.mrb[19].mxu0 }
 0x192   : > { %v1647_v35 = vpop.eup %1646  ;;  %v653_v36 = vadd.f32 1.0, %v1645_v30  ;;  %v565_v37 = vsub.f32 0.0, %v487_v27  ;;  %v490_v38 = vadd.f32 %v2303_v0, %v489_v34  ;;  %1500 = vmatprep.mubr.bf16.mxu1 %v725_v29 }
 0x193   : > { %v1649_v39 = vpop.eup %1648  ;;  %1666 = vrcp.f32 %v655_v31  ;;  %v656_v40 = vadd.f32 1.0, %v1647_v35  ;;  %v617_v41 = vmul.f32 1.442695, %v567_v32  ;;  %v568_v42 = vsub.f32 0.0, %v498_v33  ;;  %1501 = vmatmul.mubr.bf16.vlgmr.msra.gmra.mrb[0].mxu1 %v726_v25 }
 0x194   : > { %v1651_v43 = vpop.eup %1650  ;;  %1668 = vrcp.f32 %v653_v36  ;;  %v654_v44 = vadd.f32 1.0, %v1649_v39  ;;  %v613_v45 = vmul.f32 1.442695, %v565_v37  ;;  %v566_v46 = vsub.f32 0.0, %v490_v38 }
 0x195   : > { %v1653_v47 = vpop.eup %1652  ;;  %1670 = vrcp.f32 %v656_v40  ;;  %v619_v48 = vmul.f32 1.442695, %v568_v42 }
 0x196   : > { %v1655_v49 = vpop.eup %1654  ;;  %1672 = vrcp.f32 %v654_v44  ;;  %v615_v50 = vmul.f32 1.442695, %v566_v46  ;;  %v1474_v51 = vpop.f32.mrb[20].mxu0 }
 0x197   : > { %v1657_v52 = vpop.eup %1656  ;;  %1674 = vpow2.f32 %v617_v41  ;;  %v511_v53 = vadd.f32 %v1474_v51, %v2303_v0  ;;  %v502_v54 = vpop.f32.mrb[21].mxu0  ;;  %v728_v55 = vpack.c.bf16 %v1655_v49, %v1651_v43 }
 0x198   : > { %v1659_v56 = vpop.eup %1658  ;;  %1676 = vpow2.f32 %v613_v45  ;;  %v503_v57 = vadd.f32 %v2303_v0, %v502_v54  ;;  %v1475_v58 = vpop.f32.mrb[22].mxu0  ;;  %v727_v59 = vpack.c.bf16 %v1657_v52, %v1653_v47 }
 0x199   : > { %v1661_v60 = vpop.eup %1660  ;;  %v659_v61 = vadd.f32 1.0, %v1659_v56  ;;  %1678 = vpow2.f32 %v619_v48  ;;  %v571_v62 = vsub.f32 0.0, %v511_v53  ;;  %v514_v63 = vadd.f32 %v1475_v58, %v2303_v0  ;;  %v505_v1 = vpop.f32.mrb[23].mxu0 }
 0x19a   : > { %v1663_v2 = vpop.eup %1662  ;;  %v657_v3 = vadd.f32 1.0, %v1661_v60  ;;  %1680 = vpow2.f32 %v615_v50  ;;  %v569_v4 = vsub.f32 0.0, %v503_v57  ;;  %v506_v5 = vadd.f32 %v2303_v0, %v505_v1  ;;  %1504 = vmatprep.mubr.bf16.mxu1 %v727_v59 }
 0x19b   : > { %v1665_v6 = vpop.eup %1664  ;;  %1682 = vrcp.f32 %v659_v61  ;;  %v660_v7 = vadd.f32 1.0, %v1663_v2  ;;  %v625_v8 = vmul.f32 1.442695, %v571_v62  ;;  %v572_v9 = vsub.f32 0.0, %v514_v63  ;;  %1505 = vmatmul.mubr.bf16.gmra.mrb[4].mxu1 %v728_v55 }
 0x19c   : > { %1684 = vrcp.f32 %v657_v3  ;;  %v658_v10 = vadd.f32 1.0, %v1665_v6  ;;  %v621_v11 = vmul.f32 1.442695, %v569_v4  ;;  %v570_v12 = vsub.f32 0.0, %v506_v5 }
 0x19d   : > { %v1667_v13 = vpop.eup %1666  ;;  %1686 = vrcp.f32 %v660_v7  ;;  %v627_v14 = vmul.f32 1.442695, %v572_v9 }
 0x19e   : > { %v1669_v15 = vpop.eup %1668  ;;  %1688 = vrcp.f32 %v658_v10  ;;  %v623_v16 = vmul.f32 1.442695, %v570_v12  ;;  %v1478_v17 = vpop.f32.mrb[24].mxu0 }
 0x19f   : > { %v1671_v18 = vpop.eup %1670  ;;  %1690 = vpow2.f32 %v625_v8  ;;  %v527_v19 = vadd.f32 %v1478_v17, %v2303_v0  ;;  %v518_v20 = vpop.f32.mrb[25].mxu0 }
 0x1a0   : > { %v1673_v21 = vpop.eup %1672  ;;  %1692 = vpow2.f32 %v621_v11  ;;  %v730_v22 = vpack.c.bf16 %v1671_v18, %v1667_v13  ;;  %v519_v23 = vadd.f32 %v2303_v0, %v518_v20  ;;  %v1479_v24 = vpop.f32.mrb[26].mxu0 }
 0x1a1   : > { %v1675_v25 = vpop.eup %1674  ;;  %1694 = vpow2.f32 %v627_v14  ;;  %v729_v26 = vpack.c.bf16 %v1673_v21, %v1669_v15  ;;  %v575_v27 = vsub.f32 0.0, %v527_v19  ;;  %v530_v28 = vadd.f32 %v1479_v24, %v2303_v0  ;;  %v521_v29 = vpop.f32.mrb[27].mxu0 }
 0x1a2   : > { %v1677_v30 = vpop.eup %1676  ;;  %v663_v31 = vadd.f32 1.0, %v1675_v25  ;;  %1696 = vpow2.f32 %v623_v16  ;;  %v573_v32 = vsub.f32 0.0, %v519_v23  ;;  %v522_v33 = vadd.f32 %v2303_v0, %v521_v29 }
 0x1a3   : > { %v1679_v34 = vpop.eup %1678  ;;  %v661_v35 = vadd.f32 1.0, %v1677_v30  ;;  %1508 = vmatprep.mubr.bf16.mxu1 %v729_v26  ;;  %v576_v36 = vsub.f32 0.0, %v530_v28  ;;  %v633_v39 = vmul.f32 1.442695, %v575_v27 }
 0x1a4   : > { %v1681_v37 = vpop.eup %1680  ;;  %1698 = vrcp.f32 %v663_v31  ;;  %v664_v38 = vadd.f32 1.0, %v1679_v34  ;;  %1509 = vmatmul.mubr.bf16.gmra.mrb[8].mxu1 %v730_v22  ;;  %v574_v40 = vsub.f32 0.0, %v522_v33  ;;  %v629_v43 = vmul.f32 1.442695, %v573_v32 }
 0x1a5   : > { %v1683_v41 = vpop.eup %1682  ;;  %1700 = vrcp.f32 %v661_v35  ;;  %v662_v42 = vadd.f32 1.0, %v1681_v37  ;;  %v635_v45 = vmul.f32 1.442695, %v576_v36 }
 0x1a6   : > { %v1685_v44 = vpop.eup %1684  ;;  %1702 = vrcp.f32 %v664_v38  ;;  %v1482_v46 = vpop.f32.mrb[28].mxu0  ;;  %v631_v48 = vmul.f32 1.442695, %v574_v40 }
 0x1a7   : > { %v1687_v47 = vpop.eup %1686  ;;  %1704 = vrcp.f32 %v662_v42  ;;  %v543_v49 = vadd.f32 %v1482_v46, %v2303_v0  ;;  %v534_v50 = vpop.f32.mrb[29].mxu0 }
 0x1a8   : > { %v1689_v51 = vpop.eup %1688  ;;  %1706 = vpow2.f32 %v633_v39  ;;  %v732_v52 = vpack.c.bf16 %v1687_v47, %v1683_v41  ;;  %v535_v53 = vadd.f32 %v2303_v0, %v534_v50  ;;  %v1483_v54 = vpop.f32.mrb[30].mxu0 }
 0x1a9   : > { %v1691_v55 = vpop.eup %1690  ;;  %1708 = vpow2.f32 %v629_v43  ;;  %v731_v56 = vpack.c.bf16 %v1689_v51, %v1685_v44  ;;  %v579_v57 = vsub.f32 0.0, %v543_v49  ;;  %v546_v58 = vadd.f32 %v1483_v54, %v2303_v0  ;;  %v537_v59 = vpop.f32.mrb[31].mxu0  ;;  %v2337_v51 = vld [vmem:[#allocation7 + $0x8] ss:$0 sm:$0xff] }
 0x1aa   : > { %v1693_v60 = vpop.eup %1692  ;;  %v667_v61 = vadd.f32 1.0, %v1691_v55  ;;  %1710 = vpow2.f32 %v635_v45  ;;  %v577_v62 = vsub.f32 0.0, %v535_v53  ;;  %v538_v63 = vadd.f32 %v2303_v0, %v537_v59 }
 0x1ab   : > { %v1695_v1 = vpop.eup %1694  ;;  %v665_v2 = vadd.f32 1.0, %v1693_v60  ;;  %1712 = vpow2.f32 %v631_v48  ;;  %1512 = vmatprep.mubr.bf16.mxu1 %v731_v56  ;;  %v580_v3 = vsub.f32 0.0, %v546_v58  ;;  %v641_v6 = vmul.f32 1.442695, %v579_v57 }
 0x1ac   : > { %v1697_v4 = vpop.eup %1696  ;;  %1714 = vrcp.f32 %v667_v61  ;;  %v668_v5 = vadd.f32 1.0, %v1695_v1  ;;  %1513 = vmatmul.mubr.bf16.gmra.mrb[12].mxu1 %v732_v52  ;;  %v578_v7 = vsub.f32 0.0, %v538_v63  ;;  %v637_v9 = vmul.f32 1.442695, %v577_v62  ;;  %v2339_v52 = vld [vmem:[#allocation5 + $0x78] sm:$0x1] }
 0x1ad   : > { %1716 = vrcp.f32 %v665_v2  ;;  %v666_v8 = vadd.f32 1.0, %v1697_v4  ;;  %v643_v11 = vmul.f32 1.442695, %v580_v3  ;;  %1436 = vmatprep.mubr.bf16.mxu0 %v2339_v52  ;;  %v1132_v4 = vld [vmem:[#allocation7 + $0x10] sm:$0x1] }
 0x1ae   : > { %v1699_v10 = vpop.eup %1698  ;;  %1718 = vrcp.f32 %v668_v5  ;;  %v639_v0 = vmul.f32 1.442695, %v578_v7 }
 0x1af   : > { %v1701_v12 = vpop.eup %1700  ;;  %1720 = vrcp.f32 %v666_v8 }
 0x1b0   : > { %v1703_v13 = vpop.eup %1702  ;;  %1722 = vpow2.f32 %v641_v6  ;;  %v2047_v6 = vmov 0  }
 0x1b1   : > { %v1705_v14 = vpop.eup %1704  ;;  %v734_v15 = vpack.c.bf16 %v1703_v13, %v1699_v10  ;;  %1724 = vpow2.f32 %v637_v9  ;;  %1602 = vset.pattern.permute.xlu0 %v2047_v6 }
 0x1b2   : > { %v1707_v16 = vpop.eup %1706  ;;  %v733_v17 = vpack.c.bf16 %v1705_v14, %v1701_v12  ;;  %1726 = vpow2.f32 %v643_v11  ;;  %1135 = vperm.xlu0 %1602, %v1132_v4  }
 0x1b3   : > { %v1709_v18 = vpop.eup %1708  ;;  %v671_v19 = vadd.f32 1.0, %v1707_v16  ;;  %1728 = vpow2.f32 %v639_v0 }
 0x1b4   : > { %v1711_v20 = vpop.eup %1710  ;;  %v669_v21 = vadd.f32 1.0, %v1709_v18  ;;  %1516 = vmatprep.mubr.bf16.mxu1 %v733_v17 }
 0x1b5   : > { %v1713_v22 = vpop.eup %1712  ;;  %1730 = vrcp.f32 %v671_v19  ;;  %v672_v23 = vadd.f32 1.0, %v1711_v20  ;;  %1517 = vmatmul.mubr.bf16.gmra.mrb[16].mxu1 %v734_v15 }
 0x1b6   : > { %v1715_v24 = vpop.eup %1714  ;;  %1732 = vrcp.f32 %v669_v21  ;;  %v670_v25 = vadd.f32 1.0, %v1713_v22 }
 0x1b7   : > { %v1717_v26 = vpop.eup %1716  ;;  %1734 = vrcp.f32 %v672_v23 }
 0x1b8   : > { %v1719_v27 = vpop.eup %1718  ;;  %1736 = vrcp.f32 %v670_v25 }
 0x1b9   : > { %v1721_v28 = vpop.eup %1720  ;;  %v736_v29 = vpack.c.bf16 %v1719_v27, %v1715_v24 }
 0x1ba   : > { %v1723_v30 = vpop.eup %1722  ;;  %v735_v31 = vpack.c.bf16 %v1721_v28, %v1717_v26 }
 0x1bb   : > { %v1725_v32 = vpop.eup %1724  ;;  %v675_v33 = vadd.f32 1.0, %v1723_v30 }
 0x1bc   : > { %v1727_v34 = vpop.eup %1726  ;;  %v673_v35 = vadd.f32 1.0, %v1725_v32  ;;  %1520 = vmatprep.mubr.bf16.mxu1 %v735_v31 }
 0x1bd   : > { %v1729_v36 = vpop.eup %1728  ;;  %1738 = vrcp.f32 %v675_v33  ;;  %v676_v37 = vadd.f32 1.0, %v1727_v34  ;;  %1521 = vmatmul.mubr.bf16.gmra.mrb[20].mxu1 %v736_v29 }
 0x1be   : > { %1740 = vrcp.f32 %v673_v35  ;;  %v674_v38 = vadd.f32 1.0, %v1729_v36 }
 0x1bf   : > { %v1731_v39 = vpop.eup %1730  ;;  %1742 = vrcp.f32 %v676_v37 }
 0x1c0   : > { %v1733_v40 = vpop.eup %1732  ;;  %1744 = vrcp.f32 %v674_v38 }
 0x1c1   : > { %v1735_v41 = vpop.eup %1734 }
 0x1c2   : > { %v1737_v42 = vpop.eup %1736  ;;  %v738_v43 = vpack.c.bf16 %v1735_v41, %v1731_v39 }
 0x1c3   : > { %v737_v44 = vpack.c.bf16 %v1737_v42, %v1733_v40 }
 0x1c5   : > { %1524 = vmatprep.mubr.bf16.mxu1 %v737_v44 }
 0x1c6   : > { %1525 = vmatmul.mubr.bf16.gmra.mrb[24].mxu1 %v738_v43 }
 0x1c7   : > { %v1739_v45 = vpop.eup %1738 }
 0x1c8   : > { %v1741_v46 = vpop.eup %1740 }
 0x1c9   : > { %v1743_v47 = vpop.eup %1742 }
 0x1ca   : > { %v1745_v48 = vpop.eup %1744  ;;  %v740_v49 = vpack.c.bf16 %v1743_v47, %v1739_v45 }
 0x1cb   : > { %v739_v50 = vpack.c.bf16 %v1745_v48, %v1741_v46 }
 0x1cd   : > { %1528 = vmatprep.mubr.bf16.mxu1 %v739_v50 }
 0x1ce   : > { %1529 = vmatmul.mubr.bf16.gmra.mrb[28].mxu1 %v740_v49 }
 0x266   : > { %v1502_v53 = vpop.f32.mrb[0].mxu1 }
 0x267   : > { %v837_v54 = vadd.f32 %v1502_v53, %v2337_v51  ;;  %v828_v55 = vpop.f32.mrb[1].mxu1 }
 0x268   : > { %v829_v56 = vadd.f32 %v2337_v51, %v828_v55  ;;  %v1503_v57 = vpop.f32.mrb[2].mxu1 }
 0x269   : > { %v957_v58 = vsub.f32 0.0, %v837_v54  ;;  %v840_v59 = vadd.f32 %v1503_v57, %v2337_v51  ;;  %v831_v60 = vpop.f32.mrb[3].mxu1 }
 0x26a   : > { %v955_v61 = vsub.f32 0.0, %v829_v56  ;;  %v832_v62 = vadd.f32 %v2337_v51, %v831_v60 }
 0x26b   : > { %v991_v63 = vmul.f32 1.442695, %v957_v58  ;;  %v958_v1 = vsub.f32 0.0, %v840_v59 }
 0x26c   : > { %v987_v2 = vmul.f32 1.442695, %v955_v61  ;;  %v956_v3 = vsub.f32 0.0, %v832_v62 }
 0x26d   : > { %1746 = vpow2.f32 %v991_v63  ;;  %v993_v5 = vmul.f32 1.442695, %v958_v1 }
 0x26e   : > { %1748 = vpow2.f32 %v987_v2  ;;  %v989_v7 = vmul.f32 1.442695, %v956_v3  ;;  %v1506_v8 = vpop.f32.mrb[4].mxu1 }
 0x26f   : > { %1750 = vpow2.f32 %v993_v5  ;;  %v853_v9 = vadd.f32 %v1506_v8, %v2337_v51  ;;  %v844_v10 = vpop.f32.mrb[5].mxu1 }
 0x270   : > { %1752 = vpow2.f32 %v989_v7  ;;  %v845_v11 = vadd.f32 %v2337_v51, %v844_v10  ;;  %v1507_v12 = vpop.f32.mrb[6].mxu1 }
 0x271   : > { %v961_v0 = vsub.f32 0.0, %v853_v9  ;;  %v856_v13 = vadd.f32 %v1507_v12, %v2337_v51  ;;  %v847_v14 = vpop.f32.mrb[7].mxu1 }
 0x272   : > { %v959_v15 = vsub.f32 0.0, %v845_v11  ;;  %v848_v16 = vadd.f32 %v2337_v51, %v847_v14 }
 0x273   : > { %v999_v17 = vmul.f32 1.442695, %v961_v0  ;;  %v962_v18 = vsub.f32 0.0, %v856_v13 }
 0x274   : > { %v995_v19 = vmul.f32 1.442695, %v959_v15  ;;  %v960_v20 = vsub.f32 0.0, %v848_v16 }
 0x275   : > { %1754 = vpow2.f32 %v999_v17  ;;  %v1001_v21 = vmul.f32 1.442695, %v962_v18 }
 0x276   : > { %1756 = vpow2.f32 %v995_v19  ;;  %v997_v22 = vmul.f32 1.442695, %v960_v20 }
 0x277   : > { %v1747_v23 = vpop.eup %1746  ;;  %1758 = vpow2.f32 %v1001_v21  ;;  %v1510_v24 = vpop.f32.mrb[8].mxu1 }
 0x278   : > { %v1749_v25 = vpop.eup %1748  ;;  %v1053_v26 = vadd.f32 1.0, %v1747_v23  ;;  %1760 = vpow2.f32 %v997_v22  ;;  %v869_v27 = vadd.f32 %v1510_v24, %v2337_v51  ;;  %v860_v28 = vpop.f32.mrb[9].mxu1 }
 0x279   : > { %v1751_v29 = vpop.eup %1750  ;;  %v1051_v30 = vadd.f32 1.0, %v1749_v25  ;;  %v861_v31 = vadd.f32 %v2337_v51, %v860_v28  ;;  %v1511_v32 = vpop.f32.mrb[10].mxu1 }
 0x27a   : > { %v1753_v33 = vpop.eup %1752  ;;  %1762 = vrcp.f32 %v1053_v26  ;;  %v1054_v34 = vadd.f32 1.0, %v1751_v29  ;;  %v965_v35 = vsub.f32 0.0, %v869_v27  ;;  %v872_v36 = vadd.f32 %v1511_v32, %v2337_v51  ;;  %v863_v37 = vpop.f32.mrb[11].mxu1 }
 0x27b   : > { %1764 = vrcp.f32 %v1051_v30  ;;  %v1052_v38 = vadd.f32 1.0, %v1753_v33  ;;  %v963_v39 = vsub.f32 0.0, %v861_v31  ;;  %v864_v40 = vadd.f32 %v2337_v51, %v863_v37 }
 0x27c   : > { %1766 = vrcp.f32 %v1054_v34  ;;  %v1007_v41 = vmul.f32 1.442695, %v965_v35  ;;  %v966_v42 = vsub.f32 0.0, %v872_v36 }
 0x27d   : > { %1768 = vrcp.f32 %v1052_v38  ;;  %v1003_v43 = vmul.f32 1.442695, %v963_v39  ;;  %v964_v44 = vsub.f32 0.0, %v864_v40 }
 0x27e   : > { %1770 = vpow2.f32 %v1007_v41  ;;  %v1009_v45 = vmul.f32 1.442695, %v966_v42 }
 0x27f   : > { %v1755_v46 = vpop.eup %1754  ;;  %1772 = vpow2.f32 %v1003_v43  ;;  %v1005_v47 = vmul.f32 1.442695, %v964_v44  ;;  %v1514_v48 = vpop.f32.mrb[12].mxu1 }
 0x280   : > { %v1757_v49 = vpop.eup %1756  ;;  %v1057_v50 = vadd.f32 1.0, %v1755_v46  ;;  %1774 = vpow2.f32 %v1009_v45  ;;  %v885_v53 = vadd.f32 %v1514_v48, %v2337_v51  ;;  %v876_v54 = vpop.f32.mrb[13].mxu1 }
 0x281   : > { %v1759_v55 = vpop.eup %1758  ;;  %v1055_v56 = vadd.f32 1.0, %v1757_v49  ;;  %1776 = vpow2.f32 %v1005_v47  ;;  %v877_v57 = vadd.f32 %v2337_v51, %v876_v54  ;;  %v1515_v58 = vpop.f32.mrb[14].mxu1 }
 0x282   : > { %v1761_v59 = vpop.eup %1760  ;;  %1778 = vrcp.f32 %v1057_v50  ;;  %v1058_v60 = vadd.f32 1.0, %v1759_v55  ;;  %v969_v61 = vsub.f32 0.0, %v885_v53  ;;  %v888_v62 = vadd.f32 %v1515_v58, %v2337_v51  ;;  %v879_v63 = vpop.f32.mrb[15].mxu1 }
 0x283   : > { %1780 = vrcp.f32 %v1055_v56  ;;  %v1056_v1 = vadd.f32 1.0, %v1761_v59  ;;  %v967_v2 = vsub.f32 0.0, %v877_v57  ;;  %v880_v3 = vadd.f32 %v2337_v51, %v879_v63 }
 0x284   : > { %v2358_v4 = vpop.eup %1762  ;;  %1782 = vrcp.f32 %v1058_v60  ;;  %v1015_v5 = vmul.f32 1.442695, %v969_v61  ;;  %v970_v6 = vsub.f32 0.0, %v888_v62 }
 0x285   : > { %v2360_v7 = vpop.eup %1764  ;;  %1784 = vrcp.f32 %v1056_v1  ;;  %v1011_v8 = vmul.f32 1.442695, %v967_v2  ;;  %v968_v9 = vsub.f32 0.0, %v880_v3 }
 0x286   : > { %v2362_v10 = vpop.eup %1766  ;;  %1786 = vpow2.f32 %v1015_v5  ;;  %v1017_v11 = vmul.f32 1.442695, %v970_v6 }
 0x287   : > { %v2364_v12 = vpop.eup %1768  ;;  %1788 = vpow2.f32 %v1011_v8  ;;  %v1013_v0 = vmul.f32 1.442695, %v968_v9  ;;  %v1117_v13 = vpack.c.bf16 %v2362_v10, %v2358_v4 }
 0x288   : > { %v1771_v14 = vpop.eup %1770  ;;  %1790 = vpow2.f32 %v1017_v11  ;;  %v1518_v15 = vpop.f32.mrb[16].mxu1  ;;  %v1116_v16 = vpack.c.bf16 %v2364_v12, %v2360_v7 }
 0x289   : > { %v1773_v17 = vpop.eup %1772  ;;  %v1061_v18 = vadd.f32 1.0, %v1771_v14  ;;  %1792 = vpow2.f32 %v1013_v0  ;;  %v901_v19 = vadd.f32 %v1518_v15, %v2337_v51  ;;  %v892_v20 = vpop.f32.mrb[17].mxu1 }
 0x28a   : > { %v1775_v21 = vpop.eup %1774  ;;  %v1059_v22 = vadd.f32 1.0, %v1773_v17  ;;  %v893_v23 = vadd.f32 %v2337_v51, %v892_v20  ;;  %v1519_v24 = vpop.f32.mrb[18].mxu1 }
 0x28b   : > { %v1777_v25 = vpop.eup %1776  ;;  %1794 = vrcp.f32 %v1061_v18  ;;  %v1062_v26 = vadd.f32 1.0, %v1775_v21  ;;  %v973_v27 = vsub.f32 0.0, %v901_v19  ;;  %v904_v28 = vadd.f32 %v1519_v24, %v2337_v51  ;;  %v895_v29 = vpop.f32.mrb[19].mxu1 }
 0x28c   : > { %v2373_v30 = vpop.eup %1778  ;;  %1796 = vrcp.f32 %v1059_v22  ;;  %v1060_v31 = vadd.f32 1.0, %v1777_v25  ;;  %v971_v32 = vsub.f32 0.0, %v893_v23  ;;  %v896_v33 = vadd.f32 %v2337_v51, %v895_v29 }
 0x28d   : > { %v2376_v34 = vpop.eup %1780  ;;  %1798 = vrcp.f32 %v1062_v26  ;;  %v1023_v35 = vmul.f32 1.442695, %v973_v27  ;;  %v974_v36 = vsub.f32 0.0, %v904_v28 }
 0x28e   : > { %v2378_v37 = vpop.eup %1782  ;;  %1800 = vrcp.f32 %v1060_v31  ;;  %v1019_v38 = vmul.f32 1.442695, %v971_v32  ;;  %v972_v39 = vsub.f32 0.0, %v896_v33 }
 0x28f   : > { %v2380_v40 = vpop.eup %1784  ;;  %1802 = vpow2.f32 %v1023_v35  ;;  %v1025_v41 = vmul.f32 1.442695, %v974_v36  ;;  %v1119_v42 = vpack.c.bf16 %v2378_v37, %v2373_v30  ;;  %v1136_v30 = vpop.permute.xlu0 %1135 }
 0x290   : > { %v1787_v43 = vpop.eup %1786  ;;  %1804 = vpow2.f32 %v1019_v38  ;;  %v1021_v44 = vmul.f32 1.442695, %v972_v39  ;;  %v1522_v45 = vpop.f32.mrb[20].mxu1  ;;  %v1118_v46 = vpack.c.bf16 %v2380_v40, %v2376_v34 }
 0x291   : > { %v1789_v47 = vpop.eup %1788  ;;  %v1065_v48 = vadd.f32 1.0, %v1787_v43  ;;  %1806 = vpow2.f32 %v1025_v41  ;;  %v917_v49 = vadd.f32 %v1522_v45, %v2337_v51  ;;  %v908_v50 = vpop.f32.mrb[21].mxu1 }
 0x292   : > { %v1791_v53 = vpop.eup %1790  ;;  %v1063_v54 = vadd.f32 1.0, %v1789_v47  ;;  %1808 = vpow2.f32 %v1021_v44  ;;  %v909_v55 = vadd.f32 %v2337_v51, %v908_v50  ;;  %v1523_v56 = vpop.f32.mrb[22].mxu1 }
 0x293   : > { %v1793_v57 = vpop.eup %1792  ;;  %1810 = vrcp.f32 %v1065_v48  ;;  %v1066_v58 = vadd.f32 1.0, %v1791_v53  ;;  %v977_v59 = vsub.f32 0.0, %v917_v49  ;;  %v920_v60 = vadd.f32 %v1523_v56, %v2337_v51  ;;  %v911_v61 = vpop.f32.mrb[23].mxu1 }
 0x294   : > { %1812 = vrcp.f32 %v1063_v54  ;;  %v1064_v62 = vadd.f32 1.0, %v1793_v57  ;;  %v975_v63 = vsub.f32 0.0, %v909_v55  ;;  %v912_v1 = vadd.f32 %v2337_v51, %v911_v61 }
 0x295   : > { %v2390_v2 = vpop.eup %1794  ;;  %1814 = vrcp.f32 %v1066_v58  ;;  %v1031_v3 = vmul.f32 1.442695, %v977_v59  ;;  %v978_v5 = vsub.f32 0.0, %v920_v60 }
 0x296   : > { %v2392_v6 = vpop.eup %1796  ;;  %1816 = vrcp.f32 %v1064_v62  ;;  %v1027_v8 = vmul.f32 1.442695, %v975_v63  ;;  %v976_v9 = vsub.f32 0.0, %v912_v1 }
 0x297   : > { %v2394_v11 = vpop.eup %1798  ;;  %1818 = vpow2.f32 %v1031_v3  ;;  %v1033_v0 = vmul.f32 1.442695, %v978_v5 }
 0x298   : > { %v2396_v14 = vpop.eup %1800  ;;  %1820 = vpow2.f32 %v1027_v8  ;;  %v1029_v15 = vmul.f32 1.442695, %v976_v9  ;;  %v1121_v17 = vpack.c.bf16 %v2394_v11, %v2390_v2 }
 0x299   : > { %v1803_v18 = vpop.eup %1802  ;;  %1822 = vpow2.f32 %v1033_v0  ;;  %v1526_v19 = vpop.f32.mrb[24].mxu1  ;;  %v1120_v20 = vpack.c.bf16 %v2396_v14, %v2392_v6 }
 0x29a   : > { %v1805_v21 = vpop.eup %1804  ;;  %v1069_v22 = vadd.f32 1.0, %v1803_v18  ;;  %1824 = vpow2.f32 %v1029_v15  ;;  %v933_v23 = vadd.f32 %v1526_v19, %v2337_v51  ;;  %v924_v24 = vpop.f32.mrb[25].mxu1 }
 0x29b   : > { %v1807_v25 = vpop.eup %1806  ;;  %v1067_v26 = vadd.f32 1.0, %v1805_v21  ;;  %v925_v27 = vadd.f32 %v2337_v51, %v924_v24  ;;  %v1527_v28 = vpop.f32.mrb[26].mxu1 }
 0x29c   : > { %v1809_v29 = vpop.eup %1808  ;;  %1826 = vrcp.f32 %v1069_v22  ;;  %v1070_v31 = vadd.f32 1.0, %v1807_v25  ;;  %v981_v32 = vsub.f32 0.0, %v933_v23  ;;  %v936_v33 = vadd.f32 %v1527_v28, %v2337_v51  ;;  %v927_v35 = vpop.f32.mrb[27].mxu1 }
 0x29d   : > { %v2405_v36 = vpop.eup %1810  ;;  %1828 = vrcp.f32 %v1067_v26  ;;  %v1068_v38 = vadd.f32 1.0, %v1809_v29  ;;  %v979_v39 = vsub.f32 0.0, %v925_v27  ;;  %v928_v41 = vadd.f32 %v2337_v51, %v927_v35 }
 0x29e   : > { %v2408_v43 = vpop.eup %1812  ;;  %1830 = vrcp.f32 %v1070_v31  ;;  %v1039_v44 = vmul.f32 1.442695, %v981_v32  ;;  %v982_v45 = vsub.f32 0.0, %v936_v33 }
 0x29f   : > { %v2410_v47 = vpop.eup %1814  ;;  %1832 = vrcp.f32 %v1068_v38  ;;  %v1035_v48 = vmul.f32 1.442695, %v979_v39  ;;  %v980_v49 = vsub.f32 0.0, %v928_v41 }
 0x2a0   : > { %v2412_v50 = vpop.eup %1816  ;;  %1834 = vpow2.f32 %v1039_v44  ;;  %v1041_v53 = vmul.f32 1.442695, %v982_v45  ;;  %v1123_v54 = vpack.c.bf16 %v2410_v47, %v2405_v36 }
 0x2a1   : > { %v1819_v55 = vpop.eup %1818  ;;  %1836 = vpow2.f32 %v1035_v48  ;;  %v1037_v56 = vmul.f32 1.442695, %v980_v49  ;;  %v1530_v57 = vpop.f32.mrb[28].mxu1  ;;  %v1122_v58 = vpack.c.bf16 %v2412_v50, %v2408_v43 }
 0x2a2   : > { %v1821_v59 = vpop.eup %1820  ;;  %v1073_v60 = vadd.f32 1.0, %v1819_v55  ;;  %1838 = vpow2.f32 %v1041_v53  ;;  %v949_v61 = vadd.f32 %v1530_v57, %v2337_v51  ;;  %v940_v62 = vpop.f32.mrb[29].mxu1 }
 0x2a3   : > { %v1823_v63 = vpop.eup %1822  ;;  %v1071_v1 = vadd.f32 1.0, %v1821_v59  ;;  %1840 = vpow2.f32 %v1037_v56  ;;  %v941_v3 = vadd.f32 %v2337_v51, %v940_v62  ;;  %v1531_v5 = vpop.f32.mrb[30].mxu1 }
 0x2a4   : > { %v1825_v8 = vpop.eup %1824  ;;  %1842 = vrcp.f32 %v1073_v60  ;;  %v1074_v9 = vadd.f32 1.0, %v1823_v63  ;;  %v985_v0 = vsub.f32 0.0, %v949_v61  ;;  %v952_v15 = vadd.f32 %v1531_v5, %v2337_v51  ;;  %v943_v18 = vpop.f32.mrb[31].mxu1 }
 0x2a5   : > { %1844 = vrcp.f32 %v1071_v1  ;;  %v1072_v19 = vadd.f32 1.0, %v1825_v8  ;;  %v983_v21 = vsub.f32 0.0, %v941_v3  ;;  %v944_v22 = vadd.f32 %v2337_v51, %v943_v18 }
 0x2a6   : > { %v1827_v23 = vpop.eup %1826  ;;  %1846 = vrcp.f32 %v1074_v9  ;;  %v1047_v24 = vmul.f32 1.442695, %v985_v0  ;;  %v986_v25 = vsub.f32 0.0, %v952_v15 }
 0x2a7   : > { %v1829_v26 = vpop.eup %1828  ;;  %1848 = vrcp.f32 %v1072_v19  ;;  %v1043_v27 = vmul.f32 1.442695, %v983_v21  ;;  %v984_v28 = vsub.f32 0.0, %v944_v22 }
 0x2a8   : > { %v1831_v29 = vpop.eup %1830  ;;  %1850 = vpow2.f32 %v1047_v24  ;;  %v1049_v31 = vmul.f32 1.442695, %v986_v25 }
 0x2a9   : > { %v1833_v32 = vpop.eup %1832  ;;  %v1125_v33 = vpack.c.bf16 %v1831_v29, %v1827_v23  ;;  %1852 = vpow2.f32 %v1043_v27  ;;  %v1045_v35 = vmul.f32 1.442695, %v984_v28 }
 0x2aa   : > { %v1835_v38 = vpop.eup %1834  ;;  %v1124_v39 = vpack.c.bf16 %v1833_v32, %v1829_v26  ;;  %1854 = vpow2.f32 %v1049_v31 }
 0x2ab   : > { %v1837_v41 = vpop.eup %1836  ;;  %v1077_v51 = vadd.f32 1.0, %v1835_v38  ;;  %1856 = vpow2.f32 %v1045_v35 }
 0x2ac   : > { %v1839_v44 = vpop.eup %1838  ;;  %v1075_v45 = vadd.f32 1.0, %v1837_v41  ;;  %1420 = vmatprep.subr.bf16.mxu0 %v1124_v39 }
 0x2ad   : > { %v1841_v48 = vpop.eup %1840  ;;  %1858 = vrcp.f32 %v1077_v51  ;;  %v1078_v49 = vadd.f32 1.0, %v1839_v44  ;;  %1421 = vmatpush3.bf16.xpose.msra.mxu0 %v1116_v16 }
 0x2ae   : > { %v1843_v53 = vpop.eup %1842  ;;  %1860 = vrcp.f32 %v1075_v45  ;;  %v1076_v55 = vadd.f32 1.0, %v1841_v48  ;;  %1422 = vmatprep.subr.bf16.mxu0 %v1125_v33 }
 0x2af   : > { %v1845_v56 = vpop.eup %1844  ;;  %1862 = vrcp.f32 %v1078_v49 }
 0x2b0   : > { %v1847_v57 = vpop.eup %1846  ;;  %1864 = vrcp.f32 %v1076_v55 }
 0x2b1   : > { %v1849_v59 = vpop.eup %1848  ;;  %v1127_v60 = vpack.c.bf16 %v1847_v57, %v1843_v53 }
 0x2b2   : > { %v1851_v61 = vpop.eup %1850  ;;  %v1126_v62 = vpack.c.bf16 %v1849_v59, %v1845_v56 }
 0x2b3   : > { %v1853_v63 = vpop.eup %1852  ;;  %v1081_v1 = vadd.f32 1.0, %v1851_v61 }
 0x2b4   : > { %v1855_v3 = vpop.eup %1854  ;;  %v1079_v5 = vadd.f32 1.0, %v1853_v63 }
 0x2b5   : > { %v1857_v8 = vpop.eup %1856  ;;  %1866 = vrcp.f32 %v1081_v1  ;;  %v1082_v7 = vadd.f32 1.0, %v1855_v3  ;;  %1423 = vmatpush3.bf16.xpose.msra.mxu0 %v1117_v13 }
 0x2b6   : > { %1868 = vrcp.f32 %v1079_v5  ;;  %v1080_v12 = vadd.f32 1.0, %v1857_v8  ;;  %1424 = vmatprep.subr.bf16.mxu0 %v1126_v62 }
 0x2b7   : > { %v1859_v16 = vpop.eup %1858  ;;  %1870 = vrcp.f32 %v1082_v7 }
 0x2b8   : > { %v1861_v9 = vpop.eup %1860  ;;  %1872 = vrcp.f32 %v1080_v12 }
 0x2b9   : > { %v1863_v0 = vpop.eup %1862 }
 0x2ba   : > { %v1865_v15 = vpop.eup %1864  ;;  %v1129_v18 = vpack.c.bf16 %v1863_v0, %v1859_v16 }
 0x2bb   : > { %v1128_v19 = vpack.c.bf16 %v1865_v15, %v1861_v9 }
 0x2bd   : > { %1425 = vmatpush3.bf16.xpose.msra.mxu0 %v1118_v46 }
 0x2be   : > { %1426 = vmatprep.subr.bf16.mxu0 %v1127_v60 }
 0x2bf   : > { %v1867_v21 = vpop.eup %1866 }
 0x2c0   : > { %v1869_v22 = vpop.eup %1868 }
 0x2c1   : > { %v1871_v4 = vpop.eup %1870 }
 0x2c2   : > { %v1873_v10 = vpop.eup %1872  ;;  %v1131_v13 = vpack.c.bf16 %v1871_v4, %v1867_v21 }
 0x2c3   : > { %v1130_v23 = vpack.c.bf16 %v1873_v10, %v1869_v22 }
 0x2c5   : > { %1427 = vmatpush3.bf16.xpose.msra.mxu0 %v1119_v42 }
 0x2c6   : > { %1428 = vmatprep.subr.bf16.mxu0 %v1128_v19 }
 0x2cd   : > { %1429 = vmatpush3.bf16.xpose.msra.mxu0 %v1120_v20 }
 0x2ce   : > { %1430 = vmatprep.subr.bf16.mxu0 %v1129_v18 }
 0x2d5   : > { %1431 = vmatpush3.bf16.xpose.msra.mxu0 %v1121_v17 }
 0x2d6   : > { %1432 = vmatprep.subr.bf16.mxu0 %v1130_v23 }
 0x2dd   : > { %1433 = vmatpush3.bf16.xpose.msra.mxu0 %v1122_v58 }
 0x2de   : > { %1434 = vmatprep.subr.bf16.mxu0 %v1131_v13 }
 0x2e5   : > { %1435 = vmatpush3.bf16.xpose.msra.mxu0 %v1123_v54  ;;  %v1195_v54 = vlaneseq }
 0x2e7   : > { %v1196_v24 = vshrl.u32 %v1195_v54, 7  ;;  %vm1209_vm2 = vcmp.lt.s32.totalorder %v1195_v54, 256 }
 0x2ec   : > { %1437 = vmatmul.mubr.bf16.vlgmr.msra.gmra.mrb[32].mxu0 %v2339_v52  ;;  %v2048_v52 = vmov 1966171168  }
 0x2ed   : > { %v1193_v50 = vunpack.c.l.s4 %v2048_v52 }
 0x2ef   : > { %v1194_v58 = vunpack.c.0.s8 %v1193_v50 }
 0x2f1   : > { %v1197_v26 = vsub.s32 %v1194_v58, %v1196_v24 }
 0x3bf   : > { %v1172_v34 = vpop.f32.mrb[32].mxu0 }
 0x3c0   : > { %v1173_v37 = vadd.f32 %v1172_v34, %v1136_v30  ;;  %v1174_v40 = vpop.f32.mrb[33].mxu0 }
 0x3c1   : > { %v1175_v42 = vadd.f32 %v1174_v40, %v1136_v30  ;;  %v1176_v46 = vpop.f32.mrb[34].mxu0 }
 0x3c2   : > { %v1179_v2 = vsub.f32 0.0, %v1173_v37  ;;  %v1177_v6 = vpop.f32.mrb[35].mxu0 }
 0x3c3   : > { %v1180_v11 = vsub.f32 0.0, %v1175_v42 }
 0x3c4   : > { %v1181_v14 = vmul.f32 1.442695, %v1179_v2 }
 0x3c5   : > { %v1183_v17 = vmul.f32 1.442695, %v1180_v11 }
 0x3c6   : > { %1874 = vpow2.f32 %v1181_v14 }
 0x3c7   : > { %1876 = vpow2.f32 %v1183_v17 }
 0x3d0   : > { %v1875_v20 = vpop.eup %1874 }
 0x3d1   : > { %v1877_v36 = vpop.eup %1876  ;;  %v1185_v43 = vadd.f32 1.0, %v1875_v20 }
 0x3d2   : > { %v1186_v47 = vadd.f32 1.0, %v1877_v36 }
 0x3d3   : > { %1878 = vrcp.f32 %v1185_v43 }
 0x3d4   : > { %1880 = vrcp.f32 %v1186_v47 }
 0x3dd   : > { %v1879_v25 = vpop.eup %1878 }
 0x3de   : > { %v1881_v27 = vpop.eup %1880 }
 0x3df   : > { %v1191_v28 = vcombine.low %v1879_v25, %v1881_v27 }
 0x3e1   : > { %v1198_v29 = vrot.slane %v1191_v28, %v1197_v26 }
 0x3e3   : > { %v1205_v31 = vrot.slane %v1198_v29, %v1197_v26 }
 0x3e5   : > { %1211 = vst.msk [vmem:[%s223_s29] sm:$0x3] %vm1209_vm2, %v1205_v31 }
 0x3e6   : > { %1979 = shalt.err (!%p1976_p13)
}
 0x3e7   : > { %s1980_s22 = scalar_lea.hbm %s2452_s5, 32  ;;  %s1984_s19 = scalar_lea.hbm %s2499_s3, 64 }
 0x3e8   : > { %p1981_p0 = scmp.ne.s32.totalorder %s2452_s5, %s1980_s22  ;;  %p1985_p2 = scmp.lt.u32.totalorder %s2452_s5, %s2499_s3 }
 0x3e9   : > { %p1986_p8 = scmp.lt.u32.totalorder %s1984_s19, %s1980_s22  ;;  %p1988_p1 = scmp.lt.u32.totalorder %s1980_s22, %s2452_s5 }
 0x3ea   : > { %p1982_p12 = pnand %p1981_p0, %p2515_p10 }
 0x3eb   : > { %p1987_p9 = por %p1986_p8, %p1985_p2 }
 0x3ec   : > { %p1983_p7 = pneg %p1982_p12 }
 0x3ed   : > { %p1989_p3 = por %p1988_p1, %p1987_p9 }
 0x3ef   : > { %p1990_p5 = pnand %p1989_p3, %p1983_p7 }
 0x3f1   : > { %1993 = shalt.err (!%p1990_p5)
}
 0x3f2   : > { %1542 = dma.vmem_to_hbm [thread:$0]  (%p2515_p10), %s2454_s8, 32, %s2452_s5, %s1213_s6  }
 0x3f3 PF: > { %s1239_s30 = sand.u32 1, %s2024_s12   ;;  %p2516_p6 = scmp.ne.s32.totalorder %s2507_s25, 0 }
 0x3f4   : > { %s1240_s23 = scalar_lea.sflag [#allocation4], %s1239_s30 }
 0x3f5   : > { %p1552_p11 = pnand %p1320_p4, %p2516_p6 }
 0x3f7   : > { %2019 = dma.done.wait (!%p1552_p11), %s1240_s23, 32  }
 0x3f8   : > { %2021 = vsyncadd (!%p1552_p11), %s1240_s23, 4294967264  ;;  %p17_p13 = scmp.ge.s32.totalorder %s2095_s18, 4   ;;  %s2517_s12 = smov %s2028_s13 }
 0x3f9   : > { %s2518_s13 = smov %s2032_s14  ;;  %s2519_s14 = smov %s2107_s21 }
 0x3fa   : > { %s2520_s15 = smov %s2095_s18  ;;  %19 = sbr.rel (!%p17_p13) target bundleno = 6 (0x6), region = 85 }
 0x401   :  { %1245 = vsyncpa [#allocation3], 1 }
 0x402   :  { %1247 = vsyncpa [#allocation3 + $0x1], 1 }
 0x403   :  { %1248 = vsyncpa [#allocation6], 1 }
 0x404   :  { %1249 = vsyncpa [#allocation4], 1 }
 0x405   :  { %1251 = vsyncpa [#allocation4 + $0x1], 1 }

</bundles_post_ra>
